<compile_context>
chip_gen: v7x
topology: tpu7x:2x2x1
jax: 0.10.0
libtpu: 0.0.40
codegen_flags: <defaults>
</compile_context>

<pallas_src>
import functools

import jax
import jax.numpy as jnp
from jax.experimental import pallas as pl
from jax.experimental.pallas import tpu as pltpu

LANE = 128


def _round_up(v, m):
    return (v + m - 1) // m * m


def _cdiv(a, b):
    return -(-a // b)


def _vmem_capacity_bytes():
    try:
        info = pltpu.get_tpu_info()
        cap = getattr(info, "vmem_capacity_bytes", None)
        if cap:
            return int(cap)
    except Exception:
        pass
    return 128 << 20  # v5e/v6e default; v7x reports 64 MiB when queryable.


def _spec(shape, index_map, mode=None):
    if mode is None:
        return pl.BlockSpec(shape, index_map)
    return pl.BlockSpec(shape, index_map, pipeline_mode=mode)


def _mlp_kernel(x_ref, w1_ref, b1_ref, w2_ref, b2_ref, o_ref, acc_ref, *,
                apply_softmax, d_out_valid, compute_dtype):
    k = pl.program_id(1)

    @pl.when(k == 0)
    def _():
        acc_ref[...] = jnp.zeros_like(acc_ref)

    # fc1 on this H-tile: bf16 operands, f32 MXU accumulation; bias+ReLU in f32.
    x = x_ref[...].astype(compute_dtype)
    h = jnp.dot(x, w1_ref[...], preferred_element_type=jnp.float32)
    h = jnp.maximum(h + b1_ref[...], 0.0)

    # fc2 partial product for this H-tile, accumulated in f32 scratch.
    acc_ref[...] += jnp.dot(h.astype(w2_ref.dtype), w2_ref[...],
                            preferred_element_type=jnp.float32)

    @pl.when(k == pl.num_programs(1) - 1)
    def _():
        y = acc_ref[...] + b2_ref[...]
        if apply_softmax:
            if d_out_valid < y.shape[-1]:
                lane_ids = jax.lax.broadcasted_iota(jnp.int32, y.shape, 1)
                y = jnp.where(lane_ids < d_out_valid, y, -jnp.inf)
            m = jnp.max(y, axis=-1, keepdims=True)
            e = jnp.exp(y - m)
            # Exact normalization so softmax rows sum to 1 to f32 precision.
            y = e / jnp.sum(e, axis=-1, keepdims=True)
        # Narrow store: output array's last dim is the true D_out.
        o_ref[...] = y[:, :d_out_valid].astype(o_ref.dtype)


def prepare_mlp_params(w1, b1, w2, b2, compute_dtype=jnp.bfloat16):
    """Pad/cast weights once (cache the result for inference).

    w1: (D_in, H); b1: (H,); w2: (H, D_out); b2: (D_out,).
    Weights are stored [in, out] (transpose of PyTorch nn.Linear.weight).
    """
    D_in, H = w1.shape
    H2, D_out = w2.shape
    assert H == H2 and b1.shape == (H,) and b2.shape == (D_out,)

    d_in_p = _round_up(D_in, LANE)
    # 256-align H when it exceeds one lane tile: keeps the v6e/v7x 256x256 MXU full.
    h_p = _round_up(H, 256) if H > LANE else _round_up(H, LANE)
    d_out_p = _round_up(D_out, LANE)

    cdt = jnp.dtype(compute_dtype)
    w1p = jnp.pad(w1.astype(cdt), ((0, d_in_p - D_in), (0, h_p - H)))
    w2p = jnp.pad(w2.astype(cdt), ((0, h_p - H), (0, d_out_p - D_out)))
    b1p = jnp.pad(b1.astype(jnp.float32), (0, h_p - H)).reshape(1, h_p)
    b2p = jnp.pad(b2.astype(jnp.float32), (0, d_out_p - D_out)).reshape(1, d_out_p)
    return dict(w1=w1p, b1=b1p, w2=w2p, b2=b2p,
                dims=(D_in, H, D_out), compute_dtype=cdt)


def mlp_forward(x, params, apply_softmax=False, *, block_b=512, block_h=512):
    """x: (B, D_in) -> (B, D_out) float32."""
    D_in, H, D_out = params["dims"]
    cdt = params["compute_dtype"]
    w1p, b1p, w2p, b2p = params["w1"], params["b1"], params["w2"], params["b2"]
    d_in_p, h_p = w1p.shape
    d_out_p = w2p.shape[1]

    B, D_in_x = x.shape
    assert D_in_x == D_in

    SUB = 16 if cdt == jnp.dtype(jnp.bfloat16) else 8
    x_item = jnp.dtype(x.dtype).itemsize
    c_item = cdt.itemsize

    budget = int(0.72 * _vmem_capacity_bytes())

    def resident(tb, th):
        return (2 * tb * d_in_p * x_item            # x tiles (double-buffered)
                + 2 * d_in_p * th * c_item          # w1 tiles
                + 2 * th * 4                        # b1
                + 2 * th * d_out_p * c_item         # w2 tiles
                + d_out_p * 4                       # b2
                + 2 * tb * D_out * 4                # out tiles (narrow, f32)
                + tb * d_out_p * 4                  # f32 accumulator scratch
                + tb * th * (4 + c_item)            # h (f32) + bf16 copy
                + tb * d_in_p * c_item)             # bf16 x copy

    # Batch tile and hidden tile, shrunk to fit the per-generation VMEM budget.
    tb = min(_round_up(block_b, SUB), _round_up(B, SUB))
    th = min(h_p, _round_up(block_h, LANE))
    while h_p % th:
        th -= LANE
    while resident(tb, th) > budget and tb > SUB:
        tb = max(SUB, _round_up(tb // 2, SUB))
    while resident(tb, th) > budget and th > LANE:
        th -= LANE
        while h_p % th:
            th -= LANE

    # Megacore (v7x): ensure >=2 batch grid steps when B allows it.
    if _cdiv(B, tb) == 1 and B > SUB:
        tb = _round_up(_cdiv(B, 2), SUB)

    b_p = _round_up(B, tb)
    n_b = b_p // tb
    n_h = h_p // th

    # Pad x only if needed; keep original dtype (cast to bf16 inside the kernel).
    xp = x
    if (b_p, d_in_p) != (B, D_in):
        xp = jnp.pad(x, ((0, b_p - B), (0, d_in_p - D_in)))

    est = resident(tb, th)
    vmem_limit = min(budget, max(16 << 20, int(1.5 * est)))

    # Single-buffer the operands whose block index never changes.
    w_mode = pl.Buffered(1) if n_h == 1 else None

    flops = 2 * B * (D_in * H + H * D_out)
    bytes_accessed = (xp.size * x_item + w1p.size * c_item + w2p.size * c_item
                      + b1p.size * 4 + b2p.size * 4 + b_p * D_out * 4)
    cost = pl.CostEstimate(flops=int(flops),
                           transcendentals=int(B * D_out) if apply_softmax else 0,
                           bytes_accessed=int(bytes_accessed))

    kernel = functools.partial(_mlp_kernel,
                               apply_softmax=apply_softmax,
                               d_out_valid=D_out,
                               compute_dtype=cdt)

    out = pl.pallas_call(
        kernel,
        out_shape=jax.ShapeDtypeStruct((b_p, D_out), jnp.float32),
        grid=(n_b, n_h),
        in_specs=[
            _spec((tb, d_in_p), lambda i, k: (i, 0)),                    # x tile
            _spec((d_in_p, th), lambda i, k: (0, k), w_mode),            # w1 tile
            _spec((1, th), lambda i, k: (0, k), w_mode),                 # b1 tile
            _spec((th, d_out_p), lambda i, k: (k, 0), w_mode),           # w2 tile
            _spec((1, d_out_p), lambda i, k: (0, 0), pl.Buffered(1)),    # b2
        ],
        out_specs=pl.BlockSpec((tb, D_out), lambda i, k: (i, 0)),
        scratch_shapes=[pltpu.VMEM((tb, d_out_p), jnp.float32)],
        compiler_params=pltpu.CompilerParams(
            dimension_semantics=("parallel", "arbitrary"),
            vmem_limit_bytes=vmem_limit,
        ),
        cost_estimate=cost,
    )(xp, w1p, b1p, w2p, b2p)

    return out[:B]


def _ref_forward(x, w1, b1, w2, b2, apply_softmax=False,
                 compute_dtype=jnp.bfloat16):
    # Reference mirrors the kernel's bf16-operand / f32-accumulate matmuls.
    h = jnp.dot(x.astype(compute_dtype), w1.astype(compute_dtype),
                preferred_element_type=jnp.float32) + b1
    h = jnp.maximum(h, 0.0)
    y = jnp.dot(h.astype(compute_dtype), w2.astype(compute_dtype),
                preferred_element_type=jnp.float32) + b2
    if apply_softmax:
        y = jax.nn.softmax(y, axis=1)
    return y


if __name__ == "__main__":
    base_key = jax.random.PRNGKey(0)

    def run_case(case_idx, batch, d_in, hidden, d_out, **fwd_kwargs):
        key = jax.random.fold_in(base_key, case_idx)
        kx, k1, kb1, k2, kb2 = jax.random.split(key, 5)
        x = jax.random.normal(kx, (batch, d_in), dtype=jnp.float32)
        # Deterministic synthetic parameters (stored [in, out] = torch weight.T).
        w1 = jax.random.normal(k1, (d_in, hidden), dtype=jnp.float32) * 0.1
        b1 = jax.random.normal(kb1, (hidden,), dtype=jnp.float32) * 0.1
        w2 = jax.random.normal(k2, (hidden, d_out), dtype=jnp.float32) * 0.1
        b2 = jax.random.normal(kb2, (d_out,), dtype=jnp.float32) * 0.1

        params = prepare_mlp_params(w1, b1, w2, b2)
        for sm in (False, True):
            y = mlp_forward(x, params, apply_softmax=sm, **fwd_kwargs)
            jax.block_until_ready(y)
            y_ref = _ref_forward(x, w1, b1, w2, b2, apply_softmax=sm)
            assert y.shape == (batch, d_out)
            assert jnp.allclose(y, y_ref, atol=5e-3, rtol=2e-2), \
                f"mismatch (case {case_idx}, softmax={sm})"
            if sm:
                assert jnp.allclose(jnp.sum(y, axis=1), 1.0, atol=1e-3), \
                    f"softmax rows != 1 (case {case_idx})"

    # Small shapes consistent with MLP(input_dim, hidden_dim, output_dim).
    run_case(0, batch=8, d_in=16, hidden=32, d_out=8)
    # Exercises the hidden-dim tiling + accumulator path (multi-step grid).
    run_case(1, batch=24, d_in=40, hidden=300, d_out=10, block_h=128)

    print("KERNEL_OK")
</pallas_src>

<mosaic_0001>
module attributes {stable_mosaic.version = 11 : i64} {
  func.func @_mlp_kernel(%arg0: i32, %arg1: i32, %arg2: memref<16x128xf32, #tpu.memory_space<vmem>>, %arg3: memref<128x128xbf16, #tpu.memory_space<vmem>>, %arg4: memref<1x128xf32, #tpu.memory_space<vmem>>, %arg5: memref<128x128xbf16, #tpu.memory_space<vmem>>, %arg6: memref<1x128xf32, #tpu.memory_space<vmem>>, %arg7: memref<16x8xf32, #tpu.memory_space<vmem>>, %arg8: memref<16x128xf32, #tpu.memory_space<vmem>>) attributes {dimension_semantics = [#tpu.dimension_semantics<parallel>, #tpu.dimension_semantics<arbitrary>], iteration_bounds = array<i64: 1, 1>, scalar_prefetch = 0 : i64, scratch_operands = 1 : i64, tpu.core_type = #tpu.core_type<tc>, window_params = [{transform_indices = @transform_0, window_bounds = array<i64: 16, 128>}, {pipeline_mode = #tpu.pipeline_mode<synchronous>, transform_indices = @transform_1, window_bounds = array<i64: 128, 128>}, {pipeline_mode = #tpu.pipeline_mode<synchronous>, transform_indices = @transform_2, window_bounds = array<i64: 1, 128>}, {pipeline_mode = #tpu.pipeline_mode<synchronous>, transform_indices = @transform_3, window_bounds = array<i64: 128, 128>}, {pipeline_mode = #tpu.pipeline_mode<synchronous>, transform_indices = @transform_4, window_bounds = array<i64: 1, 128>}, {transform_indices = @transform_5, window_bounds = array<i64: 16, 8>}]} {
    %c0_i32 = arith.constant 0 : i32
    %0 = arith.cmpi eq, %arg1, %c0_i32 : i32
    %1 = arith.extui %0 : i1 to i32
    %c0_i32_0 = arith.constant 0 : i32
    %2 = arith.cmpi ne, %1, %c0_i32_0 : i32
    scf.if %2 {
      %cst_16 = arith.constant 0.000000e+00 : f32
      %21 = vector.broadcast %cst_16 : f32 to vector<16x128xf32>
      %c0_17 = arith.constant 0 : index
      %c0_18 = arith.constant 0 : index
      %22 = vector.load %arg8[%c0_17, %c0_18] : memref<16x128xf32, #tpu.memory_space<vmem>>, vector<16x128xf32>
      tpu.vector_store %arg8[%c0_17, %c0_18], %21 {strides = array<i32>} : memref<16x128xf32, #tpu.memory_space<vmem>>, vector<16x128xf32>,
    } else {
    }
    %c0 = arith.constant 0 : index
    %c0_1 = arith.constant 0 : index
    %3 = vector.load %arg2[%c0, %c0_1] : memref<16x128xf32, #tpu.memory_space<vmem>>, vector<16x128xf32>
    %4 = arith.truncf %3 : vector<16x128xf32> to vector<16x128xbf16>
    %c0_2 = arith.constant 0 : index
    %c0_3 = arith.constant 0 : index
    %5 = vector.load %arg3[%c0_2, %c0_3] : memref<128x128xbf16, #tpu.memory_space<vmem>>, vector<128x128xbf16>
    %cst = arith.constant dense<0.000000e+00> : vector<16x128xf32>
    %6 = tpu.matmul %4, %5, %cst {dimension_numbers = #tpu.dot_dimension_numbers<[1], [0], [0], [1], [0, 0, 1, 1], [], []>} : vector<16x128xbf16>, vector<128x128xbf16>, vector<16x128xf32> -> vector<16x128xf32>
    %c0_4 = arith.constant 0 : index
    %c0_5 = arith.constant 0 : index
    %7 = vector.load %arg4[%c0_4, %c0_5] : memref<1x128xf32, #tpu.memory_space<vmem>>, vector<1x128xf32>
    %8 = vector.broadcast %7 : vector<1x128xf32> to vector<16x128xf32>
    %9 = arith.addf %6, %8 : vector<16x128xf32>
    %cst_6 = arith.constant 0.000000e+00 : f32
    %10 = vector.broadcast %cst_6 : f32 to vector<16x128xf32>
    %11 = arith.maximumf %9, %10 : vector<16x128xf32>
    %c0_7 = arith.constant 0 : index
    %c0_8 = arith.constant 0 : index
    %12 = vector.load %arg8[%c0_7, %c0_8] : memref<16x128xf32, #tpu.memory_space<vmem>>, vector<16x128xf32>
    %13 = arith.truncf %11 : vector<16x128xf32> to vector<16x128xbf16>
    %c0_9 = arith.constant 0 : index
    %c0_10 = arith.constant 0 : index
    %14 = vector.load %arg5[%c0_9, %c0_10] : memref<128x128xbf16, #tpu.memory_space<vmem>>, vector<128x128xbf16>
    %cst_11 = arith.constant dense<0.000000e+00> : vector<16x128xf32>
    %15 = tpu.matmul %13, %14, %cst_11 {dimension_numbers = #tpu.dot_dimension_numbers<[1], [0], [0], [1], [0, 0, 1, 1], [], []>} : vector<16x128xbf16>, vector<128x128xbf16>, vector<16x128xf32> -> vector<16x128xf32>
    %16 = arith.addf %12, %15 : vector<16x128xf32>
    %c0_12 = arith.constant 0 : index
    %c0_13 = arith.constant 0 : index
    %17 = vector.load %arg8[%c0_12, %c0_13] : memref<16x128xf32, #tpu.memory_space<vmem>>, vector<16x128xf32>
    tpu.vector_store %arg8[%c0_12, %c0_13], %16 {strides = array<i32>} : memref<16x128xf32, #tpu.memory_space<vmem>>, vector<16x128xf32>,
    %c0_i32_14 = arith.constant 0 : i32
    %18 = arith.cmpi eq, %arg1, %c0_i32_14 : i32
    %19 = arith.extui %18 : i1 to i32
    %c0_i32_15 = arith.constant 0 : i32
    %20 = arith.cmpi ne, %19, %c0_i32_15 : i32
    scf.if %20 {
      %c0_16 = arith.constant 0 : index
      %c0_17 = arith.constant 0 : index
      %21 = vector.load %arg8[%c0_16, %c0_17] : memref<16x128xf32, #tpu.memory_space<vmem>>, vector<16x128xf32>
      %c0_18 = arith.constant 0 : index
      %c0_19 = arith.constant 0 : index
      %22 = vector.load %arg6[%c0_18, %c0_19] : memref<1x128xf32, #tpu.memory_space<vmem>>, vector<1x128xf32>
      %23 = vector.broadcast %22 : vector<1x128xf32> to vector<16x128xf32>
      %24 = arith.addf %21, %23 : vector<16x128xf32>
      %25 = vector.extract_strided_slice %24 {offsets = [0, 0], sizes = [16, 8], strides = [1, 1]} : vector<16x128xf32> to vector<16x8xf32>
      %c0_20 = arith.constant 0 : index
      %c0_21 = arith.constant 0 : index
      %26 = vector.load %arg7[%c0_20, %c0_21] : memref<16x8xf32, #tpu.memory_space<vmem>>, vector<16x8xf32>
      tpu.vector_store %arg7[%c0_20, %c0_21], %25 {strides = array<i32>} : memref<16x8xf32, #tpu.memory_space<vmem>>, vector<16x8xf32>,
    } else {
    }
    return
  }
  func.func @transform_0(%arg0: i32, %arg1: i32) -> (i32, i32) {
    %c0_i32 = arith.constant 0 : i32
    %c0_i32_0 = arith.constant 0 : i32
    return %arg0, %c0_i32 : i32, i32
  }
  func.func @transform_1(%arg0: i32, %arg1: i32) -> (i32, i32) {
    %c0_i32 = arith.constant 0 : i32
    %c0_i32_0 = arith.constant 0 : i32
    return %c0_i32, %arg1 : i32, i32
  }
  func.func @transform_2(%arg0: i32, %arg1: i32) -> (i32, i32) {
    %c0_i32 = arith.constant 0 : i32
    %c0_i32_0 = arith.constant 0 : i32
    return %c0_i32, %arg1 : i32, i32
  }
  func.func @transform_3(%arg0: i32, %arg1: i32) -> (i32, i32) {
    %c0_i32 = arith.constant 0 : i32
    %c0_i32_0 = arith.constant 0 : i32
    return %arg1, %c0_i32 : i32, i32
  }
  func.func @transform_4(%arg0: i32, %arg1: i32) -> (i32, i32) {
    %c0_i32 = arith.constant 0 : i32
    %c0_i32_0 = arith.constant 0 : i32
    %c0_i32_1 = arith.constant 0 : i32
    return %c0_i32, %c0_i32_0 : i32, i32
  }
  func.func @transform_5(%arg0: i32, %arg1: i32) -> (i32, i32) {
    %c0_i32 = arith.constant 0 : i32
    %c0_i32_0 = arith.constant 0 : i32
    return %arg0, %c0_i32 : i32, i32
  }
}

</mosaic_0001>

<bundles_post_ra>
// kernel: tpu_custom_call.1
= control target key start
LH: loop header
LB: loop body
LE: loop exit
PB: predicated region body
PF: predicated region fallthrough
CT: control target
= control target key end

     0   :  { %10 = vsyncpa [#allocation4], 0  ;;  %s584_s0 = inlined_call_operand.hbm [shape: f32[16,128], index: 0, kind: input, shape index: {}]   ;;  %s585_s1 = inlined_call_operand.hbm [shape: bf16[128,128], index: 1, kind: input, shape index: {}]   ;;  %s586_s2 = inlined_call_operand.vmem [shape: f32[1,128], index: 2, kind: input, shape index: {}]   ;;  %s587_s3 = inlined_call_operand.hbm [shape: bf16[128,128], index: 3, kind: input, shape index: {}]   ;;  %s588_s4 = inlined_call_operand.vmem [shape: f32[1,128], index: 4, kind: input, shape index: {}]   ;;  %s589_s5 = inlined_call_operand.vmem [shape: f32[16,8], index: 5, kind: output, shape index: {}]  }
   0x1   :  { %11 = vsyncpa [#allocation6], 0  ;;  %s491_s18 = smov [#allocation5]   ;;  %s421_s22 = scalar_lea.hbm %s585_s1, 1024 }
   0x2   :  { %s29_s19 = sshll.u32 %s491_s18, 4  ;;  %p422_p0 = scmp.ne.s32.totalorder %s585_s1, %s421_s22  ;;  %s30_s19 = int_to_ptr.vmem [resolvable:$true] %s29_s19 }
   0x3   :  { %p425_p1 = scmp.lt.u32.totalorder %s421_s22, %s585_s1 }
   0x5   :  { %p427_p2 = pnand %p425_p1, %p422_p0 }
   0x7   :  { %430 = shalt.err (!%p427_p2)
}
   0x8   :  { %s431_s27 = scalar_lea.vmem %s30_s19, 1024  ;;  %p436_p4 = scmp.lt.s32.totalorder %s30_s19, %s30_s19 }
   0x9   :  { %p432_p3 = scmp.ne.s32.totalorder %s30_s19, %s431_s27  ;;  %p437_p5 = scmp.lt.s32.totalorder %s431_s27, %s431_s27 }
   0xb   :  { %p438_p6 = por %p437_p5, %p436_p4 }
   0xd   :  { %p439_p7 = pnand %p438_p6, %p432_p3 }
   0xf   :  { %442 = shalt.err (!%p439_p7)
}
  0x10   :  { %s492_s28 = smov 64   ;;  %s493_s29 = smov 4  }
  0x11   :  { %35 = dma.hbm_to_vmem [thread:$0]  %s585_s1, 1024, %s30_s19, [#allocation6], %s492_s28, %s492_s28, %s493_s29  }
  0x12   :  { %s494_s7 = smov [#allocation3]   ;;  %s443_s11 = scalar_lea.hbm %s584_s0, 256 }
  0x13   :  { %s17_s8 = sshll.u32 %s494_s7, 4  ;;  %p444_p8 = scmp.ne.s32.totalorder %s584_s0, %s443_s11  ;;  %s18_s8 = int_to_ptr.vmem [resolvable:$true] %s17_s8 }
  0x14   :  { %p447_p9 = scmp.lt.u32.totalorder %s443_s11, %s584_s0 }
  0x16   :  { %p449_p10 = pnand %p447_p9, %p444_p8 }
  0x18   :  { %452 = shalt.err (!%p449_p10)
}
  0x19   :  { %s453_s16 = scalar_lea.vmem %s18_s8, 256  ;;  %p458_p12 = scmp.lt.s32.totalorder %s18_s8, %s18_s8 }
  0x1a   :  { %p454_p11 = scmp.ne.s32.totalorder %s18_s8, %s453_s16  ;;  %p459_p13 = scmp.lt.s32.totalorder %s453_s16, %s453_s16 }
  0x1c   :  { %p460_p0 = por %p459_p13, %p458_p12 }
  0x1e   :  { %p461_p1 = pnand %p460_p0, %p454_p11 }
  0x20   :  { %464 = shalt.err (!%p461_p1)
}
  0x21   :  { %s495_s1 = smov 128   ;;  %s496_s17 = smov 8  }
  0x22   :  { %23 = dma.hbm_to_vmem [thread:$0]  %s584_s0, 256, %s18_s8, [#allocation4], %s495_s1, %s495_s1, %s496_s17  }
  0x23   :  { %s497_s20 = smov [#allocation7]   ;;  %s465_s24 = scalar_lea.hbm %s587_s3, 1024 }
  0x24   :  { %s43_s21 = sshll.u32 %s497_s20, 4  ;;  %p466_p2 = scmp.ne.s32.totalorder %s587_s3, %s465_s24  ;;  %s44_s21 = int_to_ptr.vmem [resolvable:$true] %s43_s21 }
  0x25   :  { %p469_p3 = scmp.lt.u32.totalorder %s465_s24, %s587_s3 }
  0x27   :  { %p471_p4 = pnand %p469_p3, %p466_p2 }
  0x29   :  { %474 = shalt.err (!%p471_p4)
}
  0x2a   :  { %s475_s6 = scalar_lea.vmem %s44_s21, 1024  ;;  %p480_p6 = scmp.lt.s32.totalorder %s44_s21, %s44_s21 }
  0x2b   :  { %p476_p5 = scmp.ne.s32.totalorder %s44_s21, %s475_s6  ;;  %p481_p7 = scmp.lt.s32.totalorder %s475_s6, %s475_s6 }
  0x2d   :  { %p482_p8 = por %p481_p7, %p480_p6 }
  0x2f   :  { %p483_p9 = pnand %p482_p8, %p476_p5 }
  0x31   :  { %486 = shalt.err (!%p483_p9)
}
  0x32   :  { %49 = dma.hbm_to_vmem [thread:$0]  %s587_s3, 1024, %s44_s21, [#allocation6], %s492_s28, %s492_s28, %s493_s29  }
  0x33   :  { %487 = dma.done.wait [#allocation4], 256  }
  0x34   :  { %488 = vsyncadd [#allocation4], 4294967040 }
  0x35   :  { %489 = dma.done.wait [#allocation6], 2048  }
  0x36   :  { %490 = vsyncadd [#allocation6], 4294965248  ;;  %v498_v0 = vmov 0.0   ;;  %vm499_vm0 = vmmov 0   ;;  %v405_v1 = vld [vmem:[#allocation5] sm:$0xff]   ;;  %v406_v2 = vld [vmem:[#allocation5 + $0x8] sm:$0xff]  }
  0x37   :  { %356 = vmatprep.subr.bf16.mxu0 %v498_v0  ;;  %372 = vmatprep.mubr.msk.bf16.mxu0 %vm499_vm0, %v498_v0  ;;  %v407_v3 = vld [vmem:[#allocation5 + $0x10] sm:$0xff]   ;;  %v413_v4 = vld [vmem:[#allocation7] sm:$0xff]   ;;  %v408_v5 = vld [vmem:[#allocation5 + $0x18] sm:$0xff]   ;;  %vm311_vm1 = vcmask 64512  }
  0x38   :  { %376 = vmatprep.subr.bf16.mxu1 %v498_v0  ;;  %392 = vmatprep.mubr.msk.bf16.mxu1 %vm499_vm0, %v498_v0  ;;  %v414_v6 = vld [vmem:[#allocation7 + $0x8] sm:$0xff]   ;;  %v409_v7 = vld [vmem:[#allocation5 + $0x20] sm:$0xff]   ;;  %v415_v8 = vld [vmem:[#allocation7 + $0x10] sm:$0xff]  }
  0x39   :  { %357 = vmatpush3.bf16.msra.mxu0 %v405_v1  ;;  %377 = vmatpush3.bf16.msra.mxu1 %v413_v4  ;;  %v410_v9 = vld [vmem:[#allocation5 + $0x28] sm:$0xff]   ;;  %v416_v10 = vld [vmem:[#allocation7 + $0x18] sm:$0xff]   ;;  %v411_v11 = vld [vmem:[#allocation5 + $0x30] sm:$0xff]  }
  0x3a   :  { %358 = vmatprep.subr.bf16.mxu0 %v498_v0  ;;  %378 = vmatprep.subr.bf16.mxu1 %v498_v0  ;;  %v417_v12 = vld [vmem:[#allocation7 + $0x20] sm:$0xff]   ;;  %v412_v13 = vld [vmem:[#allocation5 + $0x38] sm:$0xff]   ;;  %v68_v14 = vld [vmem:[#allocation3] sm:$0xff] }
  0x3b   :  { %v69_v15 = vld [vmem:[#allocation3 + $0x8] sm:$0xff]  ;;  %v418_v16 = vld [vmem:[#allocation7 + $0x28] sm:$0xff]   ;;  %v419_v18 = vld [vmem:[#allocation7 + $0x30] sm:$0xff]  }
  0x3c   :  { %v70_v17 = vpack.c.bf16 %v69_v15, %v68_v14  ;;  %v420_v19 = vld [vmem:[#allocation7 + $0x38] sm:$0xff]   ;;  %v320_v20 = vld [vmem:[%s586_s2] ss:$0 sm:$0xff] }
  0x3d   :  { %359 = vmatpush3.bf16.msra.mxu0 %v406_v2  ;;  %379 = vmatpush3.bf16.msra.mxu1 %v414_v6  ;;  %v337_v30 = vld [vmem:[%s588_s4] ss:$0 sm:$0xff] }
  0x3e   :  { %360 = vmatprep.subr.bf16.mxu0 %v498_v0  ;;  %380 = vmatprep.subr.bf16.mxu1 %v498_v0 }
  0x41   :  { %361 = vmatpush3.bf16.msra.mxu0 %v407_v3  ;;  %381 = vmatpush3.bf16.msra.mxu1 %v415_v8 }
  0x42   :  { %362 = vmatprep.subr.bf16.mxu0 %v498_v0  ;;  %382 = vmatprep.subr.bf16.mxu1 %v498_v0 }
  0x45   :  { %363 = vmatpush3.bf16.msra.mxu0 %v408_v5  ;;  %383 = vmatpush3.bf16.msra.mxu1 %v416_v10 }
  0x46   :  { %364 = vmatprep.subr.bf16.mxu0 %v498_v0  ;;  %384 = vmatprep.subr.bf16.mxu1 %v498_v0 }
  0x49   :  { %365 = vmatpush3.bf16.msra.mxu0 %v409_v7  ;;  %385 = vmatpush3.bf16.msra.mxu1 %v417_v12 }
  0x4a   :  { %366 = vmatprep.subr.bf16.mxu0 %v498_v0  ;;  %386 = vmatprep.subr.bf16.mxu1 %v498_v0 }
  0x4d   :  { %367 = vmatpush3.bf16.msra.mxu0 %v410_v9  ;;  %387 = vmatpush3.bf16.msra.mxu1 %v418_v16 }
  0x4e   :  { %368 = vmatprep.subr.bf16.mxu0 %v498_v0  ;;  %388 = vmatprep.subr.bf16.mxu1 %v498_v0 }
  0x51   :  { %369 = vmatpush3.bf16.msra.mxu0 %v411_v11  ;;  %389 = vmatpush3.bf16.msra.mxu1 %v419_v18 }
  0x52   :  { %370 = vmatprep.subr.bf16.mxu0 %v498_v0  ;;  %390 = vmatprep.subr.bf16.mxu1 %v498_v0 }
  0x55   :  { %371 = vmatpush3.bf16.msra.mxu0 %v412_v13  ;;  %391 = vmatpush3.bf16.msra.mxu1 %v420_v19 }
  0x58   :  { %373 = vmatmul.mubr.bf16.vlgmr.msra.gmra.mrb[0].mxu0 %v70_v17 }
 0x12b   :  { %v176_v21 = vpop.f32.mrb[0].mxu0 }
 0x12c   :  { %v177_v22 = vadd.f32 %v320_v20, %v176_v21  ;;  %v374_v23 = vpop.f32.mrb[1].mxu0 }
 0x12d   :  { %v179_v24 = vpop.f32.mrb[2].mxu0 }
 0x12e   :  { %v180_v25 = vadd.f32 %v320_v20, %v179_v24  ;;  %v375_v26 = vpop.f32.mrb[3].mxu0  ;;  %v183_v27 = vmax.f32 %v177_v22, 0.0 }
 0x130   :  { %v184_v28 = vmax.f32 %v180_v25, 0.0 }
 0x132   :  { %v187_v29 = vpack.c.bf16 %v184_v28, %v183_v27 }
 0x134   :  { %393 = vmatmul.mubr.bf16.vlgmr.msra.gmra.mrb[0].mxu1 %v187_v29 }
 0x207   :  { %v286_v31 = vpop.f32.mrb[0].mxu1 }
 0x208   :  { %v309_v32 = vadd.f32 %v337_v30, %v286_v31  ;;  %v394_v33 = vpop.f32.mrb[1].mxu1 }
 0x209   :  { %v289_v34 = vpop.f32.mrb[2].mxu1 }
 0x20a   :  { %312 = vst.msk [vmem:[%s589_s5] sm:$0xff] %vm311_vm1, %v309_v32  ;;  %v310_v35 = vadd.f32 %v337_v30, %v289_v34  ;;  %v395_v36 = vpop.f32.mrb[3].mxu1 }
 0x20c   :  { %313 = vst.msk [vmem:[%s589_s5 + $0x8] sm:$0xff] %vm311_vm1, %v310_v35 }
 0x20d   :  { %318 = vsyncpa [#allocation4], 1 }
 0x20e   :  { %319 = vsyncpa [#allocation6], 1 }

</bundles_post_ra>
